<compile_context>
chip_gen: v7x
topology: tpu7x:2x2x1
jax: 0.10.0
libtpu: 0.0.40
codegen_flags: <defaults>
</compile_context>

<pallas_src>
import functools

import jax
import jax.numpy as jnp
from jax.experimental import pallas as pl
from jax.experimental.pallas import tpu as pltpu

HIDDEN = 24     # fc1 / fc2 width from the PyTorch module
LANE = 128      # TPU lane width
SUBLANE = 8     # TPU sublane width


def _round_up(x, m):
    return -(-x // m) * m


def _qnetwork_kernel(x_ref, p_ref, out_ref, *, d, s_blk):
    """x_ref: (TB, s_blk); p_ref: (s_blk + 2*d + 8, d) packed params; out_ref: (TB, d).

    Packed layout:
      rows [0        : s_blk      ]  W1 (state_size x HIDDEN, zero padded)
      rows [s_blk    : s_blk +  d ]  W2 (HIDDEN x HIDDEN, zero padded)
      rows [s_blk+d  : s_blk + 2d ]  W3 (HIDDEN x action_size, zero padded)
      rows [s_blk+2d : s_blk+2d+3 ]  b1, b2, b3 (one row each)
    """
    base = s_blk + 2 * d
    x = x_ref[...]                                                # (TB, s_blk)

    # fc1 + bias + relu.  Padding columns of x / rows of W1 are zero, so the
    # narrow-K matmul is exact.
    h1 = jnp.dot(x, p_ref[0:s_blk, :], preferred_element_type=jnp.float32)
    h1 = jnp.maximum(h1 + p_ref[base + 0:base + 1, :], 0.0)

    # dropout(p=0.6): identity in eval mode.
    # TODO(synk): training-mode dropout (pltpu.prng_seed/prng_random_bits mask) not emitted.

    # fc2 + bias + relu (full lane-dense K; padded rows/cols are zero).
    h2 = jnp.dot(h1, p_ref[s_blk:s_blk + d, :],
                 preferred_element_type=jnp.float32)
    h2 = jnp.maximum(h2 + p_ref[base + 1:base + 2, :], 0.0)

    # fc3 + bias; lane-dense (TB, d) store, real Q-values in cols [:action_size].
    out_ref[...] = (jnp.dot(h2, p_ref[s_blk + d:s_blk + 2 * d, :],
                            preferred_element_type=jnp.float32)
                    + p_ref[base + 2:base + 3, :])


def init_qnetwork_params(key, state_size, action_size):
    """PyTorch nn.Linear-style init (U[-1/sqrt(fan_in), 1/sqrt(fan_in)]).
    Weights stored as (in, out)."""
    def linear(k, fan_in, fan_out):
        kw, kb = jax.random.split(k)
        bound = 1.0 / jnp.sqrt(jnp.asarray(fan_in, jnp.float32))
        w = jax.random.uniform(kw, (fan_in, fan_out), jnp.float32, -bound, bound)
        b = jax.random.uniform(kb, (1, fan_out), jnp.float32, -bound, bound)
        return w, b

    k1, k2, k3 = jax.random.split(key, 3)
    w1, b1 = linear(k1, state_size, HIDDEN)
    w2, b2 = linear(k2, HIDDEN, HIDDEN)
    w3, b3 = linear(k3, HIDDEN, action_size)
    return {"w1": w1, "b1": b1, "w2": w2, "b2": b2, "w3": w3, "b3": b3}


def pack_qnetwork_params(params, state_size, action_size):
    """Pack w1,b1,w2,b2,w3,b3 into one lane-aligned (s_blk + 2*D + 8, D) f32 slab."""
    d = max(_round_up(HIDDEN, LANE), _round_up(action_size, LANE))
    s_blk = _round_up(state_size, SUBLANE)
    rows = s_blk + 2 * d + 8
    slab = jnp.zeros((rows, d), jnp.float32)
    # weights (stored (in, out); padding stays zero so padded lanes contribute 0)
    slab = slab.at[0:state_size, 0:HIDDEN].set(params["w1"])
    slab = slab.at[s_blk:s_blk + HIDDEN, 0:HIDDEN].set(params["w2"])
    slab = slab.at[s_blk + d:s_blk + d + HIDDEN, 0:action_size].set(params["w3"])
    # biases, one row each
    base = s_blk + 2 * d
    slab = slab.at[base + 0, 0:HIDDEN].set(params["b1"].reshape(-1))
    slab = slab.at[base + 1, 0:HIDDEN].set(params["b2"].reshape(-1))
    slab = slab.at[base + 2, 0:action_size].set(params["b3"].reshape(-1))
    return slab


def qnetwork_forward(x, packed_slab, state_size, action_size):
    """x: (batch, state_size) f32.  packed_slab: from pack_qnetwork_params."""
    rows, d = packed_slab.shape
    s_blk = _round_up(state_size, SUBLANE)
    assert rows == s_blk + 2 * d + 8, "slab/state_size mismatch"

    batch = x.shape[0]
    x = x.astype(jnp.float32)

    # Batch tile: multiple of 8 sublanes; cap so double-buffered (x + out) tiles
    # stay tiny relative to even v7x's 32 MiB scoped VMEM.
    tb = min(512, _round_up(batch, SUBLANE))
    b_pad = _round_up(batch, tb)

    # Pad only when needed (demo shapes pass straight through, zero extra ops).
    pad_b, pad_s = b_pad - batch, s_blk - state_size
    if pad_b or pad_s:
        x = jnp.pad(x, ((0, pad_b), (0, pad_s)))

    grid = (b_pad // tb,)
    kernel = functools.partial(_qnetwork_kernel, d=d, s_blk=s_blk)

    out = pl.pallas_call(
        kernel,
        out_shape=jax.ShapeDtypeStruct((b_pad, d), jnp.float32),
        grid=grid,
        in_specs=[
            pl.BlockSpec((tb, s_blk), lambda i: (i, 0)),    # batch tiles stream
            pl.BlockSpec((rows, d), lambda i: (0, 0)),      # params stay resident
        ],
        out_specs=pl.BlockSpec((tb, d), lambda i: (i, 0)),  # lane-dense writeback
        compiler_params=pltpu.CompilerParams(
            dimension_semantics=("parallel",)),
        cost_estimate=pl.CostEstimate(
            flops=2 * b_pad * (s_blk * d + 2 * d * d),      # 3 matmuls per row
            transcendentals=0,
            bytes_accessed=4 * (b_pad * s_blk + b_pad * d + rows * d)),
    )(x, packed_slab)

    return out[:batch, :action_size]


def qnetwork_reference(x, params):
    """Pure-JAX reference (unpadded params) for correctness checking."""
    h1 = jnp.maximum(x @ params["w1"] + params["b1"], 0.0)
    h2 = jnp.maximum(h1 @ params["w2"] + params["b2"], 0.0)
    return h2 @ params["w3"] + params["b3"]


if __name__ == "__main__":
    key = jax.random.PRNGKey(0)
    k_params, k_x = jax.random.split(key)

    state_size = 16
    action_size = 4
    batch = 8

    params = init_qnetwork_params(k_params, state_size, action_size)
    slab = pack_qnetwork_params(params, state_size, action_size)
    x = jax.random.normal(k_x, (batch, state_size), jnp.float32)

    out = qnetwork_forward(x, slab, state_size, action_size)
    out = jax.block_until_ready(out)

    ref = qnetwork_reference(x, params)
    assert out.shape == (batch, action_size)
    assert jnp.allclose(out, ref, atol=1e-5, rtol=1e-5), "mismatch vs reference"

    print("KERNEL_OK")
</pallas_src>

<mosaic_0001>
module attributes {stable_mosaic.version = 11 : i64} {
  func.func @_qnetwork_kernel(%arg0: i32, %arg1: memref<8x16xf32, #tpu.memory_space<vmem>>, %arg2: memref<280x128xf32, #tpu.memory_space<vmem>>, %arg3: memref<8x128xf32, #tpu.memory_space<vmem>>) attributes {dimension_semantics = [#tpu.dimension_semantics<parallel>], iteration_bounds = array<i64: 1>, scalar_prefetch = 0 : i64, scratch_operands = 0 : i64, tpu.core_type = #tpu.core_type<tc>, window_params = [{transform_indices = @transform_0, window_bounds = array<i64: 8, 16>}, {pipeline_mode = #tpu.pipeline_mode<synchronous>, transform_indices = @transform_1, window_bounds = array<i64: 280, 128>}, {transform_indices = @transform_2, window_bounds = array<i64: 8, 128>}]} {
    %c0 = arith.constant 0 : index
    %c0_0 = arith.constant 0 : index
    %0 = vector.load %arg1[%c0, %c0_0] : memref<8x16xf32, #tpu.memory_space<vmem>>, vector<8x16xf32>
    %c0_1 = arith.constant 0 : index
    %c0_2 = arith.constant 0 : index
    %1 = vector.load %arg2[%c0_1, %c0_2] : memref<280x128xf32, #tpu.memory_space<vmem>>, vector<16x128xf32>
    %cst = arith.constant dense<0.000000e+00> : vector<8x128xf32>
    %2 = tpu.matmul %0, %1, %cst {dimension_numbers = #tpu.dot_dimension_numbers<[1], [0], [0], [1], [0, 0, 1, 1], [], []>} : vector<8x16xf32>, vector<16x128xf32>, vector<8x128xf32> -> vector<8x128xf32>
    %c272 = arith.constant 272 : index
    %c0_3 = arith.constant 0 : index
    %3 = vector.load %arg2[%c272, %c0_3] : memref<280x128xf32, #tpu.memory_space<vmem>>, vector<1x128xf32>
    %4 = vector.broadcast %3 : vector<1x128xf32> to vector<8x128xf32>
    %5 = arith.addf %2, %4 : vector<8x128xf32>
    %cst_4 = arith.constant 0.000000e+00 : f32
    %6 = vector.broadcast %cst_4 : f32 to vector<8x128xf32>
    %7 = arith.maximumf %5, %6 : vector<8x128xf32>
    %c16 = arith.constant 16 : index
    %c0_5 = arith.constant 0 : index
    %8 = vector.load %arg2[%c16, %c0_5] : memref<280x128xf32, #tpu.memory_space<vmem>>, vector<128x128xf32>
    %cst_6 = arith.constant dense<0.000000e+00> : vector<8x128xf32>
    %9 = tpu.matmul %7, %8, %cst_6 {dimension_numbers = #tpu.dot_dimension_numbers<[1], [0], [0], [1], [0, 0, 1, 1], [], []>} : vector<8x128xf32>, vector<128x128xf32>, vector<8x128xf32> -> vector<8x128xf32>
    %c273 = arith.constant 273 : index
    %c0_7 = arith.constant 0 : index
    %10 = vector.load %arg2[%c273, %c0_7] : memref<280x128xf32, #tpu.memory_space<vmem>>, vector<1x128xf32>
    %11 = vector.broadcast %10 : vector<1x128xf32> to vector<8x128xf32>
    %12 = arith.addf %9, %11 : vector<8x128xf32>
    %cst_8 = arith.constant 0.000000e+00 : f32
    %13 = vector.broadcast %cst_8 : f32 to vector<8x128xf32>
    %14 = arith.maximumf %12, %13 : vector<8x128xf32>
    %c144 = arith.constant 144 : index
    %c0_9 = arith.constant 0 : index
    %15 = vector.load %arg2[%c144, %c0_9] : memref<280x128xf32, #tpu.memory_space<vmem>>, vector<128x128xf32>
    %cst_10 = arith.constant dense<0.000000e+00> : vector<8x128xf32>
    %16 = tpu.matmul %14, %15, %cst_10 {dimension_numbers = #tpu.dot_dimension_numbers<[1], [0], [0], [1], [0, 0, 1, 1], [], []>} : vector<8x128xf32>, vector<128x128xf32>, vector<8x128xf32> -> vector<8x128xf32>
    %c274 = arith.constant 274 : index
    %c0_11 = arith.constant 0 : index
    %17 = vector.load %arg2[%c274, %c0_11] : memref<280x128xf32, #tpu.memory_space<vmem>>, vector<1x128xf32>
    %18 = vector.broadcast %17 : vector<1x128xf32> to vector<8x128xf32>
    %19 = arith.addf %16, %18 : vector<8x128xf32>
    %c0_12 = arith.constant 0 : index
    %c0_13 = arith.constant 0 : index
    %20 = vector.load %arg3[%c0_12, %c0_13] : memref<8x128xf32, #tpu.memory_space<vmem>>, vector<8x128xf32>
    tpu.vector_store %arg3[%c0_12, %c0_13], %19 {strides = array<i32>} : memref<8x128xf32, #tpu.memory_space<vmem>>, vector<8x128xf32>,
    return
  }
  func.func @transform_0(%arg0: i32) -> (i32, i32) {
    %c0_i32 = arith.constant 0 : i32
    %c0_i32_0 = arith.constant 0 : i32
    return %arg0, %c0_i32 : i32, i32
  }
  func.func @transform_1(%arg0: i32) -> (i32, i32) {
    %c0_i32 = arith.constant 0 : i32
    %c0_i32_0 = arith.constant 0 : i32
    %c0_i32_1 = arith.constant 0 : i32
    return %c0_i32, %c0_i32_0 : i32, i32
  }
  func.func @transform_2(%arg0: i32) -> (i32, i32) {
    %c0_i32 = arith.constant 0 : i32
    %c0_i32_0 = arith.constant 0 : i32
    return %arg0, %c0_i32 : i32, i32
  }
}

</mosaic_0001>

<bundles_post_ra>
// kernel: tpu_custom_call.1
= control target key start
LH: loop header
LB: loop body
LE: loop exit
PB: predicated region body
PF: predicated region fallthrough
CT: control target
= control target key end

     0   :  { %7 = vsyncpa [#allocation3], 0  ;;  %s656_s0 = inlined_call_operand.hbm [shape: f32[8,16], index: 0, kind: input, shape index: {}]   ;;  %s657_s1 = inlined_call_operand.hbm [shape: f32[280,128], index: 1, kind: input, shape index: {}]   ;;  %s658_s2 = inlined_call_operand.hbm [shape: f32[8,128], index: 2, kind: output, shape index: {}]  }
   0x1   :  { %8 = vsyncpa [#allocation6], 0 }
   0x2   :  { %9 = vsyncpa [#allocation4], 0  ;;  %s570_s9 = smov [#allocation2]   ;;  %s571_s11 = smov [#allocation5]  }
   0x3   :  { %s16_s10 = sshll.u32 %s570_s9, 4  ;;  %s25_s12 = sshll.u32 %s571_s11, 4  ;;  %s17_s10 = int_to_ptr.vmem [resolvable:$true] %s16_s10  ;;  %s593_s12 = int_to_ptr.vmem [resolvable:$true] %s25_s12 }
   0x4   :  { %s498_s15 = scalar_lea.hbm %s656_s0, 128 }
   0x5   :  { %p499_p0 = scmp.ne.s32.totalorder %s656_s0, %s498_s15  ;;  %p502_p1 = scmp.lt.u32.totalorder %s498_s15, %s656_s0 }
   0x7   :  { %p504_p2 = pnand %p502_p1, %p499_p0 }
   0x9   :  { %507 = shalt.err (!%p504_p2)
}
   0xa   :  { %s508_s20 = scalar_lea.vmem %s17_s10, 128  ;;  %p513_p4 = scmp.lt.s32.totalorder %s17_s10, %s17_s10 }
   0xb   :  { %p509_p3 = scmp.ne.s32.totalorder %s17_s10, %s508_s20  ;;  %p514_p5 = scmp.lt.s32.totalorder %s508_s20, %s508_s20 }
   0xd   :  { %p515_p6 = por %p514_p5, %p513_p4 }
   0xf   :  { %p516_p7 = pnand %p515_p6, %p509_p3 }
  0x11   :  { %519 = shalt.err (!%p516_p7)
}
  0x12   :  { %19 = dma.hbm_to_vmem [thread:$0]  %s656_s0, 128, %s17_s10, [#allocation3]  }
  0x13   :  { %s520_s25 = scalar_lea.hbm %s657_s1, 4480 }
  0x14   :  { %p521_p8 = scmp.ne.s32.totalorder %s657_s1, %s520_s25  ;;  %p524_p9 = scmp.lt.u32.totalorder %s520_s25, %s657_s1 }
  0x16   :  { %p526_p10 = pnand %p524_p9, %p521_p8 }
  0x18   :  { %529 = shalt.err (!%p526_p10)
}
  0x19   :  { %s530_s30 = scalar_lea.vmem %s593_s12, 4480  ;;  %p535_p12 = scmp.lt.s32.totalorder %s593_s12, %s593_s12 }
  0x1a   :  { %p531_p11 = scmp.ne.s32.totalorder %s593_s12, %s530_s30  ;;  %p536_p13 = scmp.lt.s32.totalorder %s530_s30, %s530_s30 }
  0x1c   :  { %p537_p0 = por %p536_p13, %p535_p12 }
  0x1e   :  { %p538_p1 = pnand %p537_p0, %p531_p11 }
  0x20   :  { %541 = shalt.err (!%p538_p1)
}
  0x21   :  { %s572_s0 = smov 128   ;;  %s573_s3 = smov 8  }
  0x22   :  { %31 = dma.hbm_to_vmem [thread:$0]  %s657_s1, 4480, %s593_s12, [#allocation6], %s572_s0, %s572_s0, %s573_s3  }
  0x23   :  { %564 = dma.done.wait [#allocation3], 128  }
  0x24   :  { %565 = vsyncadd [#allocation3], 4294967168 }
  0x25   :  { %566 = dma.done.wait [#allocation6], 4480  }
  0x26   :  { %567 = vsyncadd [#allocation6], 4294962816  ;;  %v574_v0 = vmov 0.0|0.0   ;;  %vm575_vm0 = vmmov 0   ;;  %v576_v1 = vmov 0.0   ;;  %v39_v2 = vld [vmem:[#allocation5] sm:$0xff] }
  0x27   :  { %439 = vmatprep.subr.bf16.mxu0 %v574_v0  ;;  %366 = vmatprep.mubr.msk.f32.mxu0 %vm575_vm0, %v576_v1  ;;  %v40_v3 = vld [vmem:[#allocation5 + $0x8] sm:$0xff]  ;;  %v121_v5 = vld [vmem:[#allocation5 + $0x10] sm:$0xff]  ;;  %v122_v6 = vld [vmem:[#allocation5 + $0x18] sm:$0xff]  ;;  %vm46_vm1 = vcmask 130048   ;;  %s577_s1 = smov [#allocation7]  }
  0x28   :  { %442 = vmatprep.subr.bf16.mxu1 %v574_v0  ;;  %401 = vmatprep.mubr.msk.f32.mxu1 %vm575_vm0, %v576_v1  ;;  %v440_v4 = vpack.c.bf16 %v40_v3, %v39_v2  ;;  %v123_v7 = vld [vmem:[#allocation5 + $0x20] sm:$0xff]  ;;  %v443_v8 = vpack.c.bf16 %v122_v6, %v121_v5  ;;  %v124_v9 = vld [vmem:[#allocation5 + $0x28] sm:$0xff]  ;;  %v38_v10 = vld [vmem:[#allocation2] sm:$0xff]  ;;  %s311_s6 = sshll.u32 %s577_s1, 4  ;;  %s312_s6 = int_to_ptr.vmem [resolvable:$true] %s311_s6 }
  0x29   :  { %v446_v11 = vpack.c.bf16 %v124_v9, %v123_v7  ;;  %v125_v12 = vld [vmem:[#allocation5 + $0x30] sm:$0xff]  ;;  %v126_v13 = vld [vmem:[#allocation5 + $0x38] sm:$0xff]  ;;  %v127_v15 = vld [vmem:[#allocation5 + $0x40] sm:$0xff]  ;;  %s542_s7 = scalar_lea.vmem %s312_s6, 128  ;;  %p547_p3 = scmp.lt.s32.totalorder %s312_s6, %s312_s6 }
  0x2a   :  { %441 = vmatpush3.bf16.msra.mxu0 %v440_v4  ;;  %444 = vmatpush3.bf16.msra.mxu1 %v443_v8  ;;  %v449_v14 = vpack.c.bf16 %v126_v13, %v125_v12  ;;  %v128_v16 = vld [vmem:[#allocation5 + $0x48] sm:$0xff]  ;;  %v129_v18 = vld [vmem:[#allocation5 + $0x50] sm:$0xff]  ;;  %v130_v19 = vld [vmem:[#allocation5 + $0x58] sm:$0xff]  ;;  %p543_p2 = scmp.ne.s32.totalorder %s312_s6, %s542_s7  ;;  %p548_p4 = scmp.lt.s32.totalorder %s542_s7, %s542_s7 }
  0x2b   :  { %466 = vmatprep.subr.bf16.mxu0 %v574_v0  ;;  %445 = vmatprep.subr.bf16.mxu1 %v574_v0  ;;  %v452_v17 = vpack.c.bf16 %v128_v16, %v127_v15  ;;  %v455_v20 = vpack.c.bf16 %v130_v19, %v129_v18  ;;  %v131_v21 = vld [vmem:[#allocation5 + $0x60] sm:$0xff]  ;;  %v132_v22 = vld [vmem:[#allocation5 + $0x68] sm:$0xff]  ;;  %v133_v24 = vld [vmem:[#allocation5 + $0x70] sm:$0xff] }
  0x2c   :  { %v458_v23 = vpack.c.bf16 %v132_v22, %v131_v21  ;;  %v134_v25 = vld [vmem:[#allocation5 + $0x78] sm:$0xff]  ;;  %v135_v27 = vld [vmem:[#allocation5 + $0x80] sm:$0xff]  ;;  %v136_v28 = vld [vmem:[#allocation5 + $0x88] sm:$0xff]  ;;  %p549_p5 = por %p548_p4, %p547_p3 }
  0x2d   :  { %367 = vmatmul.mubr.msk.f32.vlgmr.msra.gmra.mrb[0].mxu0 %vm46_vm1, %v38_v10  ;;  %v461_v26 = vpack.c.bf16 %v134_v25, %v133_v24  ;;  %v464_v29 = vpack.c.bf16 %v136_v28, %v135_v27  ;;  %v213_v30 = vld [vmem:[#allocation5 + $0x90] sm:$0xff]  ;;  %v214_v31 = vld [vmem:[#allocation5 + $0x98] sm:$0xff]  ;;  %v215_v32 = vld [vmem:[#allocation5 + $0xa0] sm:$0xff] }
  0x2e   :  { %436 = vmatprep.mubr.msk.f32.mxu0 %vm575_vm0, %v576_v1  ;;  %447 = vmatpush3.bf16.msra.mxu1 %v446_v11  ;;  %v467_v33 = vpack.c.bf16 %v214_v31, %v213_v30  ;;  %v216_v34 = vld [vmem:[#allocation5 + $0xa8] sm:$0xff]  ;;  %v217_v36 = vld [vmem:[#allocation5 + $0xb0] sm:$0xff]  ;;  %v218_v37 = vld [vmem:[#allocation5 + $0xb8] sm:$0xff]  ;;  %p550_p6 = pnand %p549_p5, %p543_p2 }
  0x2f   :  { %448 = vmatprep.subr.bf16.mxu1 %v574_v0  ;;  %v470_v35 = vpack.c.bf16 %v216_v34, %v215_v32  ;;  %v473_v38 = vpack.c.bf16 %v218_v37, %v217_v36  ;;  %v219_v39 = vld [vmem:[#allocation5 + $0xc0] sm:$0xff]  ;;  %v220_v40 = vld [vmem:[#allocation5 + $0xc8] sm:$0xff]  ;;  %v221_v42 = vld [vmem:[#allocation5 + $0xd0] sm:$0xff] }
  0x30   :  { %468 = vmatpush3.bf16.msra.mxu0 %v467_v33  ;;  %v476_v41 = vpack.c.bf16 %v220_v40, %v219_v39  ;;  %v222_v43 = vld [vmem:[#allocation5 + $0xd8] sm:$0xff]  ;;  %v223_v45 = vld [vmem:[#allocation5 + $0xe0] sm:$0xff]  ;;  %v224_v46 = vld [vmem:[#allocation5 + $0xe8] sm:$0xff] }
  0x31   :  { %469 = vmatprep.subr.bf16.mxu0 %v574_v0  ;;  %v479_v44 = vpack.c.bf16 %v222_v43, %v221_v42  ;;  %v482_v47 = vpack.c.bf16 %v224_v46, %v223_v45  ;;  %v225_v48 = vld [vmem:[#allocation5 + $0xf0] sm:$0xff]  ;;  %v226_v49 = vld [vmem:[#allocation5 + $0xf8] sm:$0xff]  ;;  %v227_v56 = vld [vmem:[#allocation5 + $0x100] sm:$0xff] }
  0x32   :  { %450 = vmatpush3.bf16.msra.mxu1 %v449_v14  ;;  %v485_v50 = vpack.c.bf16 %v226_v49, %v225_v48  ;;  %v321_v51 = vld [vmem:[#allocation5 + $0x110] ss:$0 sm:$0xff]  ;;  %v228_v57 = vld [vmem:[#allocation5 + $0x108] sm:$0xff]  ;;  %v323_v59 = vld [vmem:[#allocation5 + $0x111] ss:$0 sm:$0xff] }
  0x33   :  { %451 = vmatprep.subr.bf16.mxu1 %v574_v0  ;;  %v488_v58 = vpack.c.bf16 %v228_v57, %v227_v56  ;;  %v324_v1 = vld [vmem:[#allocation5 + $0x112] ss:$0 sm:$0xff] }
  0x34   :  { %471 = vmatpush3.bf16.msra.mxu0 %v470_v35 }
  0x35   :  { %472 = vmatprep.subr.bf16.mxu0 %v574_v0 }
  0x36   :  { %453 = vmatpush3.bf16.msra.mxu1 %v452_v17 }
  0x37   :  { %454 = vmatprep.subr.bf16.mxu1 %v574_v0 }
  0x38   :  { %474 = vmatpush3.bf16.msra.mxu0 %v473_v38 }
  0x39   :  { %475 = vmatprep.subr.bf16.mxu0 %v574_v0 }
  0x3a   :  { %456 = vmatpush3.bf16.msra.mxu1 %v455_v20 }
  0x3b   :  { %457 = vmatprep.subr.bf16.mxu1 %v574_v0 }
  0x3c   :  { %477 = vmatpush3.bf16.msra.mxu0 %v476_v41 }
  0x3d   :  { %478 = vmatprep.subr.bf16.mxu0 %v574_v0 }
  0x3e   :  { %459 = vmatpush3.bf16.msra.mxu1 %v458_v23 }
  0x3f   :  { %460 = vmatprep.subr.bf16.mxu1 %v574_v0 }
  0x40   :  { %480 = vmatpush3.bf16.msra.mxu0 %v479_v44 }
  0x41   :  { %481 = vmatprep.subr.bf16.mxu0 %v574_v0 }
  0x42   :  { %462 = vmatpush3.bf16.msra.mxu1 %v461_v26 }
  0x43   :  { %463 = vmatprep.subr.bf16.mxu1 %v574_v0 }
  0x44   :  { %483 = vmatpush3.bf16.msra.mxu0 %v482_v47 }
  0x45   :  { %484 = vmatprep.subr.bf16.mxu0 %v574_v0 }
  0x46   :  { %465 = vmatpush3.bf16.msra.mxu1 %v464_v29 }
  0x48   :  { %486 = vmatpush3.bf16.msra.mxu0 %v485_v50 }
  0x49   :  { %487 = vmatprep.subr.bf16.mxu0 %v574_v0 }
  0x4c   :  { %489 = vmatpush3.bf16.msra.mxu0 %v488_v58 }
 0x100   :  { %v116_v52 = vpop.f32.mrb[0].mxu0 }
 0x101   :  { %v117_v53 = vadd.f32 %v321_v51, %v116_v52  ;;  %v368_v54 = vpop.f32.mrb[1].mxu0 }
 0x103   :  { %v120_v55 = vmax.f32 %v117_v53, 0.0 }
 0x105   :  { %402 = vmatmul.mubr.f32.vlgmr.msra.gmra.mrb[0].mxu1 %v120_v55 }
 0x1d8   :  { %v208_v60 = vpop.f32.mrb[0].mxu1 }
 0x1d9   :  { %v209_v61 = vadd.f32 %v323_v59, %v208_v60  ;;  %v403_v62 = vpop.f32.mrb[1].mxu1 }
 0x1db   :  { %v212_v63 = vmax.f32 %v209_v61, 0.0 }
 0x1dd   :  { %437 = vmatmul.mubr.f32.vlgmr.msra.gmra.mrb[2].mxu0 %v212_v63 }
 0x2b0   :  { %v300_v0 = vpop.f32.mrb[2].mxu0 }
 0x2b1   :  { %v301_v2 = vadd.f32 %v324_v1, %v300_v0  ;;  %v438_v3 = vpop.f32.mrb[3].mxu0 }
 0x2b3   :  { %304 = vst [vmem:[#allocation7] sm:$0xff] %v301_v2 }
 0x2b4   :  { %553 = shalt.err (!%p550_p6)
}
 0x2b5   :  { %s554_s10 = scalar_lea.hbm %s658_s2, 128 }
 0x2b6   :  { %p555_p7 = scmp.ne.s32.totalorder %s658_s2, %s554_s10  ;;  %p558_p8 = scmp.lt.u32.totalorder %s554_s10, %s658_s2 }
 0x2b8   :  { %p560_p9 = pnand %p558_p8, %p555_p7 }
 0x2ba   :  { %563 = shalt.err (!%p560_p9)
}
 0x2bb   :  { %314 = dma.vmem_to_hbm [thread:$0]  %s312_s6, 128, %s658_s2, [#allocation4]  }
 0x2bc   :  { %568 = dma.done.wait [#allocation4], 128  }
 0x2bd   :  { %569 = vsyncadd [#allocation4], 4294967168 }
 0x2be   :  { %318 = vsyncpa [#allocation3], 1 }
 0x2bf   :  { %319 = vsyncpa [#allocation6], 1 }
 0x2c0   :  { %320 = vsyncpa [#allocation4], 1 }

</bundles_post_ra>
